<compile_context>
chip_gen: v5e
topology: v5e:2x2
jax: 0.10.0
libtpu: 0.0.40
codegen_flags: <defaults>
</compile_context>

<pallas_src>
import functools
import math

import jax
import jax.numpy as jnp
from jax.experimental import pallas as pl
from jax.experimental.pallas import tpu as pltpu


def _round_up(x, m):
    return ((x + m - 1) // m) * m


@functools.lru_cache(maxsize=None)
def _vmem_limit_bytes():
    """Per-generation scoped-VMEM limit (v7x: 64 MiB/TC; v5e/v6e: 128 MiB)."""
    cap = 64 << 20                       # conservative default, fits every gen
    try:
        info = pltpu.get_tpu_info()
        cap = int(getattr(info, "vmem_capacity_bytes", cap) or cap)
    except Exception:
        pass
    return (80 << 20) if cap >= (128 << 20) else (44 << 20)


# ---------------------------------------------------------------------------
# Kernel 1: implicit-GEMM 3x3 stride-1 conv (+shift +residual +ReLU epilogue)
# ---------------------------------------------------------------------------
def _make_implicit3x3_kernel(cin, cout, m_rows, offs, apply_relu, has_residual):
    def kernel(*refs):
        if has_residual:
            x_ref, w_ref, t_ref, r_ref, o_ref = refs
        else:
            x_ref, w_ref, t_ref, o_ref = refs
            r_ref = None
        acc = jnp.zeros((m_rows, cout), jnp.float32)
        # Unrolled loop over the 9 taps: each tap is a contiguous shifted slice
        # of the flattened padded image (implicit GEMM, no im2col in HBM).
        for t, off in enumerate(offs):
            a_t = x_ref[pl.ds(off, m_rows), :]          # (m_rows, cin) bf16
            w_t = w_ref[pl.ds(t * cin, cin), :]          # (cin, cout)  bf16
            acc = acc + jnp.dot(a_t, w_t, preferred_element_type=jnp.float32)
        out = acc + t_ref[...]                           # folded-BN shift (f32)
        if has_residual:
            out = out + r_ref[...].astype(jnp.float32)
        if apply_relu:
            out = jnp.maximum(out, 0.0)
        o_ref[...] = out.astype(o_ref.dtype)
    return kernel


def conv3x3_s1_implicit(x, cp, relu, residual=None):
    """3x3 stride-1 pad-1 conv via implicit GEMM. x: NHWC bf16."""
    N, H, W, Cin = x.shape
    Cout = cp["cout"]
    Wq = W + 2                       # padded row width (2 garbage cols per row)
    M = H * Wq                       # output rows per image (incl. garbage cols)
    flat_len = (H + 2) * Wq + 2      # flattened padded-image slab length
    offs = tuple(i * Wq + j for i in range(3) for j in range(3))

    # [N,H,W,C] -> zero-pad spatially -> flatten -> pad flat dim by (1,1).
    xp = jnp.pad(x.astype(jnp.bfloat16), ((0, 0), (1, 1), (1, 1), (0, 0)))
    xp = xp.reshape(N, (H + 2) * Wq, Cin)
    xp = jnp.pad(xp, ((0, 0), (1, 1), (0, 0)))

    ins = [xp, cp["w"], cp["shift"]]
    in_specs = [
        pl.BlockSpec((None, flat_len, Cin), lambda n: (n, 0, 0)),   # per image
        pl.BlockSpec((9 * Cin, Cout), lambda n: (0, 0)),            # resident W
        pl.BlockSpec((1, Cout), lambda n: (0, 0)),                  # BN shift
    ]
    has_res = residual is not None
    if has_res:
        r = jnp.pad(residual.astype(jnp.bfloat16), ((0, 0), (0, 0), (1, 1), (0, 0)))
        r = r.reshape(N, M, Cout)
        ins.append(r)
        in_specs.append(pl.BlockSpec((None, M, Cout), lambda n: (n, 0, 0)))

    out = pl.pallas_call(
        _make_implicit3x3_kernel(Cin, Cout, M, offs, relu, has_res),
        out_shape=jax.ShapeDtypeStruct((N, M, Cout), jnp.bfloat16),
        grid_spec=pltpu.PrefetchScalarGridSpec(
            num_scalar_prefetch=0,
            grid=(N,),
            in_specs=in_specs,
            out_specs=pl.BlockSpec((None, M, Cout), lambda n: (n, 0, 0)),
        ),
        compiler_params=pltpu.CompilerParams(
            dimension_semantics=("parallel",),
            vmem_limit_bytes=_vmem_limit_bytes()),
    )(*ins)
    # Drop the 2 garbage pad columns per output row.
    return out.reshape(N, H, Wq, Cout)[:, :, 1:1 + W, :]


# ---------------------------------------------------------------------------
# Kernel 2: fused matmul (stem / stride-2 / 1x1 convs), resident full-K weight
# ---------------------------------------------------------------------------
def _make_matmul_kernel(apply_relu, has_residual):
    def kernel(*refs):
        if has_residual:
            a_ref, b_ref, t_ref, r_ref, o_ref = refs
        else:
            a_ref, b_ref, t_ref, o_ref = refs
            r_ref = None
        acc = jnp.dot(a_ref[...], b_ref[...], preferred_element_type=jnp.float32)
        out = acc + t_ref[...]                           # folded-BN shift (f32)
        if has_residual:
            out = out + r_ref[...].astype(jnp.float32)
        if apply_relu:
            out = jnp.maximum(out, 0.0)
        o_ref[...] = out.astype(o_ref.dtype)
    return kernel


def fused_matmul(a, b, shift, residual=None, relu=False, out_dtype=jnp.bfloat16):
    """out = relu( a @ b + shift + residual ).  a:[M,K], b:[K,N] (BN-scale folded)."""
    M, K = a.shape
    K2, N = b.shape
    assert K == K2
    a = a.astype(jnp.bfloat16)
    b = b.astype(jnp.bfloat16)

    # Weight is one full [K, N] VMEM-resident block (N = Cout <= 512).
    tm_cap = 512 if K <= 1024 else 256
    tm = min(tm_cap, _round_up(M, 8))
    # Expose >=2 grid steps by splitting M (keeps weight resident, full-N stores).
    if _round_up(M, tm) // tm < 2 and tm >= 16:
        tm = _round_up(tm // 2, 8)
    Mp = _round_up(M, tm)
    if Mp != M:
        a = jnp.pad(a, ((0, Mp - M), (0, 0)))

    ins = [a, b, shift.astype(jnp.float32).reshape(1, N)]
    in_specs = [
        pl.BlockSpec((tm, K), lambda i: (i, 0)),     # streamed activations
        pl.BlockSpec((K, N), lambda i: (0, 0)),      # resident full weight
        pl.BlockSpec((1, N), lambda i: (0, 0)),
    ]
    has_res = residual is not None
    if has_res:
        r = residual.astype(jnp.bfloat16)
        if Mp != M:
            r = jnp.pad(r, ((0, Mp - M), (0, 0)))
        ins.append(r)
        in_specs.append(pl.BlockSpec((tm, N), lambda i: (i, 0)))

    out = pl.pallas_call(
        _make_matmul_kernel(relu, has_res),
        out_shape=jax.ShapeDtypeStruct((Mp, N), out_dtype),
        grid_spec=pltpu.PrefetchScalarGridSpec(
            num_scalar_prefetch=0,
            grid=(Mp // tm,),
            in_specs=in_specs,
            out_specs=pl.BlockSpec((tm, N), lambda i: (i, 0)),
        ),
        compiler_params=pltpu.CompilerParams(
            dimension_semantics=("parallel",),
            vmem_limit_bytes=_vmem_limit_bytes()),
    )(*ins)
    return out[:M] if Mp != M else out


# ---------------------------------------------------------------------------
# im2col (only for the 7x7 stem, 3x3 stride-2 and 1x1 convs) + conv dispatcher
# ---------------------------------------------------------------------------
def im2col(x, kh, kw, stride, pad):
    """x: NHWC bf16 -> patches [N*oh*ow, kh*kw*C] (feature order kh,kw,C)."""
    N, H, W, C = x.shape
    xpad = jnp.pad(x, ((0, 0), (pad, pad), (pad, pad), (0, 0)))
    oh = (H + 2 * pad - kh) // stride + 1
    ow = (W + 2 * pad - kw) // stride + 1
    if kh == 1 and kw == 1:
        patches = xpad[:, ::stride, ::stride, :]
        return patches.reshape(N * oh * ow, C), oh, ow
    cols = []
    for i in range(kh):
        for j in range(kw):
            cols.append(xpad[:, i:i + stride * oh:stride,
                             j:j + stride * ow:stride, :])
    patches = jnp.stack(cols, axis=-2)                  # [N, oh, ow, kh*kw, C]
    return patches.reshape(N * oh * ow, kh * kw * C), oh, ow


def conv_bn(x, cp, stride, pad, relu, residual=None):
    """x NHWC bf16, cp = prepared conv dict (BN scale folded into weight)."""
    if cp["kh"] == 3 and cp["kw"] == 3 and stride == 1 and pad == 1:
        return conv3x3_s1_implicit(x, cp, relu, residual)
    patches, oh, ow = im2col(x, cp["kh"], cp["kw"], stride, pad)
    cout = cp["cout"]
    res_flat = None if residual is None else residual.reshape(-1, cout)
    y = fused_matmul(patches, cp["w"], cp["shift"], residual=res_flat, relu=relu)
    return y.reshape(x.shape[0], oh, ow, cout)


# ---------------------------------------------------------------------------
# Pooling / head (plain XLA: trivially mem-bound / tiny shapes)
# ---------------------------------------------------------------------------
def maxpool_3x3_s2_p1(x):
    N, H, W, C = x.shape
    xpad = jnp.pad(x, ((0, 0), (1, 1), (1, 1), (0, 0)),
                   constant_values=-jnp.inf)
    oh = (H + 2 - 3) // 2 + 1
    ow = (W + 2 - 3) // 2 + 1
    out = None
    for i in range(3):
        for j in range(3):
            s = xpad[:, i:i + 2 * oh:2, j:j + 2 * ow:2, :]
            out = s if out is None else jnp.maximum(out, s)
    return out


# ---------------------------------------------------------------------------
# ResNet (BasicBlock, expansion=1) forward
# ---------------------------------------------------------------------------
def basic_block_forward(x, p):
    stride = p["stride"]
    if p["downsample"] is not None:
        identity = conv_bn(x, p["downsample"], stride=stride, pad=0, relu=False)
    else:
        identity = x
    out = conv_bn(x, p["conv1"], stride=stride, pad=1, relu=True)
    out = conv_bn(out, p["conv2"], stride=1, pad=1, relu=True, residual=identity)
    return out


def resnet_forward(prep, x_nchw, include_top=True):
    # NCHW f32 -> NHWC bf16 activations (halves HBM traffic between layers).
    x = jnp.transpose(x_nchw, (0, 2, 3, 1)).astype(jnp.bfloat16)
    x = conv_bn(x, prep["conv1"], stride=2, pad=3, relu=True)
    x = maxpool_3x3_s2_p1(x)
    for name in ("layer1", "layer2", "layer3", "layer4"):
        for blk in prep[name]:
            x = basic_block_forward(x, blk)
    if not include_top:
        return jnp.transpose(x, (0, 3, 1, 2)).astype(jnp.float32)
    feat = x.astype(jnp.float32).mean(axis=(1, 2))           # [N, 512]
    logits = feat @ prep["fc_w"].T + prep["fc_b"]            # [N, num_classes]
    return logits


# ---------------------------------------------------------------------------
# Deterministic parameter initialization (mirrors the PyTorch __init__)
# ---------------------------------------------------------------------------
def _init_conv(key, cout, cin, kh, kw):
    fan_out = cout * kh * kw                      # kaiming_normal_, fan_out, relu
    std = math.sqrt(2.0 / fan_out)
    return jax.random.normal(key, (cout, cin, kh, kw), jnp.float32) * std


def _bn_affine(c, eps=1e-5):
    gamma = jnp.ones((c,), jnp.float32)
    beta = jnp.zeros((c,), jnp.float32)
    mean = jnp.zeros((c,), jnp.float32)
    var = jnp.ones((c,), jnp.float32)
    scale = gamma / jnp.sqrt(var + eps)
    shift = beta - mean * scale
    return scale, shift


def make_resnet18_params(key, num_classes=10):
    keys = iter(jax.random.split(key, 64))
    params = {}
    params["conv1_w"] = _init_conv(next(keys), 64, 3, 7, 7)
    params["bn1_scale"], params["bn1_shift"] = _bn_affine(64)

    in_c = 64
    blocks_num = [2, 2, 2, 2]          # ResNet-18 with BasicBlock (expansion=1)
    channels = [64, 128, 256, 512]
    strides = [1, 2, 2, 2]
    for li, (ch, nb, st) in enumerate(zip(channels, blocks_num, strides), 1):
        layer = []
        for b in range(nb):
            stride = st if b == 0 else 1
            blk = {"stride": stride}
            if stride != 1 or in_c != ch:
                ds_w = _init_conv(next(keys), ch, in_c, 1, 1)
                ds_s, ds_t = _bn_affine(ch)
                blk["downsample"] = {"w": ds_w, "scale": ds_s, "shift": ds_t}
            else:
                blk["downsample"] = None
            blk["conv1_w"] = _init_conv(next(keys), ch, in_c, 3, 3)
            blk["bn1_scale"], blk["bn1_shift"] = _bn_affine(ch)
            blk["conv2_w"] = _init_conv(next(keys), ch, ch, 3, 3)
            blk["bn2_scale"], blk["bn2_shift"] = _bn_affine(ch)
            layer.append(blk)
            in_c = ch
        params[f"layer{li}"] = layer

    bound = 1.0 / math.sqrt(in_c)                     # nn.Linear default init
    kw_, kb_ = jax.random.split(next(keys))
    params["fc_w"] = jax.random.uniform(kw_, (num_classes, in_c), jnp.float32,
                                        -bound, bound)
    params["fc_b"] = jax.random.uniform(kb_, (num_classes,), jnp.float32,
                                        -bound, bound)
    return params


# ---------------------------------------------------------------------------
# One-time parameter preparation: kernel-ready layouts, BN scale folded into W
# ---------------------------------------------------------------------------
def _prep_conv(w, scale, shift):
    cout, cin, kh, kw = w.shape
    # [Cout, Cin, KH, KW] -> [KH*KW*Cin, Cout]; fold BN scale per column (f32).
    wm = jnp.transpose(w, (2, 3, 1, 0)).reshape(kh * kw * cin, cout)
    wm = wm * scale.reshape(1, cout)
    return {"w": wm.astype(jnp.bfloat16), "kh": kh, "kw": kw,
            "cin": cin, "cout": cout,
            "shift": shift.reshape(1, cout).astype(jnp.float32)}


def prepare_params(params):
    prep = {
        "conv1": _prep_conv(params["conv1_w"], params["bn1_scale"],
                            params["bn1_shift"]),
        "fc_w": params["fc_w"].astype(jnp.float32),
        "fc_b": params["fc_b"].astype(jnp.float32),
    }
    for name in ("layer1", "layer2", "layer3", "layer4"):
        blocks = []
        for blk in params[name]:
            pb = {"stride": blk["stride"],
                  "conv1": _prep_conv(blk["conv1_w"], blk["bn1_scale"],
                                      blk["bn1_shift"]),
                  "conv2": _prep_conv(blk["conv2_w"], blk["bn2_scale"],
                                      blk["bn2_shift"]),
                  "downsample": None}
            if blk["downsample"] is not None:
                ds = blk["downsample"]
                pb["downsample"] = _prep_conv(ds["w"], ds["scale"], ds["shift"])
            blocks.append(pb)
        prep[name] = blocks
    return prep


if __name__ == "__main__":
    key = jax.random.PRNGKey(0)
    kx, kp, kc1, kc2 = jax.random.split(key, 4)

    # --- spot-check: implicit-GEMM 3x3 conv vs XLA conv (loose bf16 tolerance)
    xs = jax.random.normal(kc1, (2, 8, 9, 64), jnp.float32).astype(jnp.bfloat16)
    wconv = _init_conv(kc2, 64, 64, 3, 3)
    s0, t0 = _bn_affine(64)
    cp_chk = _prep_conv(wconv, s0, t0)
    got = conv3x3_s1_implicit(xs, cp_chk, relu=False).astype(jnp.float32)
    ref = jax.lax.conv_general_dilated(
        xs.astype(jnp.float32),
        jnp.transpose(wconv, (2, 3, 1, 0)).astype(jnp.bfloat16).astype(jnp.float32),
        window_strides=(1, 1), padding=((1, 1), (1, 1)),
        dimension_numbers=("NHWC", "HWIO", "NHWC"))
    assert bool(jnp.allclose(got, ref, atol=1e-1, rtol=1e-1)), \
        float(jnp.max(jnp.abs(got - ref)))

    # --- full ResNet-18 forward ----------------------------------------------
    x = jax.random.normal(kx, (2, 3, 32, 32), jnp.float32)   # NCHW input
    params = make_resnet18_params(kp, num_classes=10)
    prep = prepare_params(params)                             # one-time prep

    fwd = jax.jit(lambda inp: resnet_forward(prep, inp))
    logits = jax.block_until_ready(fwd(x))

    assert logits.shape == (2, 10), logits.shape
    assert bool(jnp.all(jnp.isfinite(logits)))
    print("KERNEL_OK")
</pallas_src>

<mosaic_0001>
module attributes {stable_mosaic.version = 11 : i64} {
  func.func @kernel(%arg0: i32, %arg1: memref<1x112x64xbf16, #tpu.memory_space<vmem>>, %arg2: memref<576x64xbf16, #tpu.memory_space<vmem>>, %arg3: memref<1x64xf32, #tpu.memory_space<vmem>>, %arg4: memref<1x88x64xbf16, #tpu.memory_space<vmem>>) attributes {dimension_semantics = [#tpu.dimension_semantics<parallel>], iteration_bounds = array<i64: 2>, scalar_prefetch = 0 : i64, scratch_operands = 0 : i64, tpu.core_type = #tpu.core_type<tc>, window_params = [{transform_indices = @transform_0, window_bounds = array<i64: 1, 112, 64>}, {pipeline_mode = #tpu.pipeline_mode<synchronous>, transform_indices = @transform_1, window_bounds = array<i64: 576, 64>}, {pipeline_mode = #tpu.pipeline_mode<synchronous>, transform_indices = @transform_2, window_bounds = array<i64: 1, 64>}, {transform_indices = @transform_3, window_bounds = array<i64: 1, 88, 64>}]} {
    %cst = arith.constant 0.000000e+00 : f32
    %0 = vector.broadcast %cst : f32 to vector<88x64xf32>
    %c0 = arith.constant 0 : index
    %c0_0 = arith.constant 0 : index
    %c0_1 = arith.constant 0 : index
    %1 = vector.load %arg1[%c0, %c0_0, %c0_1] : memref<1x112x64xbf16, #tpu.memory_space<vmem>>, vector<1x88x64xbf16>
    %2 = vector.shape_cast %1 : vector<1x88x64xbf16> to vector<88x64xbf16>
    %c0_2 = arith.constant 0 : index
    %c0_3 = arith.constant 0 : index
    %3 = vector.load %arg2[%c0_2, %c0_3] : memref<576x64xbf16, #tpu.memory_space<vmem>>, vector<64x64xbf16>
    %cst_4 = arith.constant dense<0.000000e+00> : vector<88x64xf32>
    %4 = tpu.matmul %2, %3, %cst_4 {dimension_numbers = #tpu.dot_dimension_numbers<[1], [0], [0], [1], [0, 0, 1, 1], [], []>} : vector<88x64xbf16>, vector<64x64xbf16>, vector<88x64xf32> -> vector<88x64xf32>
    %5 = arith.addf %0, %4 : vector<88x64xf32>
    %c0_5 = arith.constant 0 : index
    %c1 = arith.constant 1 : index
    %c0_6 = arith.constant 0 : index
    %6 = vector.load %arg1[%c0_5, %c1, %c0_6] : memref<1x112x64xbf16, #tpu.memory_space<vmem>>, vector<1x88x64xbf16>
    %7 = vector.shape_cast %6 : vector<1x88x64xbf16> to vector<88x64xbf16>
    %c64 = arith.constant 64 : index
    %c0_7 = arith.constant 0 : index
    %8 = vector.load %arg2[%c64, %c0_7] : memref<576x64xbf16, #tpu.memory_space<vmem>>, vector<64x64xbf16>
    %cst_8 = arith.constant dense<0.000000e+00> : vector<88x64xf32>
    %9 = tpu.matmul %7, %8, %cst_8 {dimension_numbers = #tpu.dot_dimension_numbers<[1], [0], [0], [1], [0, 0, 1, 1], [], []>} : vector<88x64xbf16>, vector<64x64xbf16>, vector<88x64xf32> -> vector<88x64xf32>
    %10 = arith.addf %5, %9 : vector<88x64xf32>
    %c0_9 = arith.constant 0 : index
    %c2 = arith.constant 2 : index
    %c0_10 = arith.constant 0 : index
    %11 = vector.load %arg1[%c0_9, %c2, %c0_10] : memref<1x112x64xbf16, #tpu.memory_space<vmem>>, vector<1x88x64xbf16>
    %12 = vector.shape_cast %11 : vector<1x88x64xbf16> to vector<88x64xbf16>
    %c128 = arith.constant 128 : index
    %c0_11 = arith.constant 0 : index
    %13 = vector.load %arg2[%c128, %c0_11] : memref<576x64xbf16, #tpu.memory_space<vmem>>, vector<64x64xbf16>
    %cst_12 = arith.constant dense<0.000000e+00> : vector<88x64xf32>
    %14 = tpu.matmul %12, %13, %cst_12 {dimension_numbers = #tpu.dot_dimension_numbers<[1], [0], [0], [1], [0, 0, 1, 1], [], []>} : vector<88x64xbf16>, vector<64x64xbf16>, vector<88x64xf32> -> vector<88x64xf32>
    %15 = arith.addf %10, %14 : vector<88x64xf32>
    %c0_13 = arith.constant 0 : index
    %c11 = arith.constant 11 : index
    %c0_14 = arith.constant 0 : index
    %16 = vector.load %arg1[%c0_13, %c11, %c0_14] : memref<1x112x64xbf16, #tpu.memory_space<vmem>>, vector<1x88x64xbf16>
    %17 = vector.shape_cast %16 : vector<1x88x64xbf16> to vector<88x64xbf16>
    %c192 = arith.constant 192 : index
    %c0_15 = arith.constant 0 : index
    %18 = vector.load %arg2[%c192, %c0_15] : memref<576x64xbf16, #tpu.memory_space<vmem>>, vector<64x64xbf16>
    %cst_16 = arith.constant dense<0.000000e+00> : vector<88x64xf32>
    %19 = tpu.matmul %17, %18, %cst_16 {dimension_numbers = #tpu.dot_dimension_numbers<[1], [0], [0], [1], [0, 0, 1, 1], [], []>} : vector<88x64xbf16>, vector<64x64xbf16>, vector<88x64xf32> -> vector<88x64xf32>
    %20 = arith.addf %15, %19 : vector<88x64xf32>
    %c0_17 = arith.constant 0 : index
    %c12 = arith.constant 12 : index
    %c0_18 = arith.constant 0 : index
    %21 = vector.load %arg1[%c0_17, %c12, %c0_18] : memref<1x112x64xbf16, #tpu.memory_space<vmem>>, vector<1x88x64xbf16>
    %22 = vector.shape_cast %21 : vector<1x88x64xbf16> to vector<88x64xbf16>
    %c256 = arith.constant 256 : index
    %c0_19 = arith.constant 0 : index
    %23 = vector.load %arg2[%c256, %c0_19] : memref<576x64xbf16, #tpu.memory_space<vmem>>, vector<64x64xbf16>
    %cst_20 = arith.constant dense<0.000000e+00> : vector<88x64xf32>
    %24 = tpu.matmul %22, %23, %cst_20 {dimension_numbers = #tpu.dot_dimension_numbers<[1], [0], [0], [1], [0, 0, 1, 1], [], []>} : vector<88x64xbf16>, vector<64x64xbf16>, vector<88x64xf32> -> vector<88x64xf32>
    %25 = arith.addf %20, %24 : vector<88x64xf32>
    %c0_21 = arith.constant 0 : index
    %c13 = arith.constant 13 : index
    %c0_22 = arith.constant 0 : index
    %26 = vector.load %arg1[%c0_21, %c13, %c0_22] : memref<1x112x64xbf16, #tpu.memory_space<vmem>>, vector<1x88x64xbf16>
    %27 = vector.shape_cast %26 : vector<1x88x64xbf16> to vector<88x64xbf16>
    %c320 = arith.constant 320 : index
    %c0_23 = arith.constant 0 : index
    %28 = vector.load %arg2[%c320, %c0_23] : memref<576x64xbf16, #tpu.memory_space<vmem>>, vector<64x64xbf16>
    %cst_24 = arith.constant dense<0.000000e+00> : vector<88x64xf32>
    %29 = tpu.matmul %27, %28, %cst_24 {dimension_numbers = #tpu.dot_dimension_numbers<[1], [0], [0], [1], [0, 0, 1, 1], [], []>} : vector<88x64xbf16>, vector<64x64xbf16>, vector<88x64xf32> -> vector<88x64xf32>
    %30 = arith.addf %25, %29 : vector<88x64xf32>
    %c0_25 = arith.constant 0 : index
    %c22 = arith.constant 22 : index
    %c0_26 = arith.constant 0 : index
    %31 = vector.load %arg1[%c0_25, %c22, %c0_26] : memref<1x112x64xbf16, #tpu.memory_space<vmem>>, vector<1x88x64xbf16>
    %32 = vector.shape_cast %31 : vector<1x88x64xbf16> to vector<88x64xbf16>
    %c384 = arith.constant 384 : index
    %c0_27 = arith.constant 0 : index
    %33 = vector.load %arg2[%c384, %c0_27] : memref<576x64xbf16, #tpu.memory_space<vmem>>, vector<64x64xbf16>
    %cst_28 = arith.constant dense<0.000000e+00> : vector<88x64xf32>
    %34 = tpu.matmul %32, %33, %cst_28 {dimension_numbers = #tpu.dot_dimension_numbers<[1], [0], [0], [1], [0, 0, 1, 1], [], []>} : vector<88x64xbf16>, vector<64x64xbf16>, vector<88x64xf32> -> vector<88x64xf32>
    %35 = arith.addf %30, %34 : vector<88x64xf32>
    %c0_29 = arith.constant 0 : index
    %c23 = arith.constant 23 : index
    %c0_30 = arith.constant 0 : index
    %36 = vector.load %arg1[%c0_29, %c23, %c0_30] : memref<1x112x64xbf16, #tpu.memory_space<vmem>>, vector<1x88x64xbf16>
    %37 = vector.shape_cast %36 : vector<1x88x64xbf16> to vector<88x64xbf16>
    %c448 = arith.constant 448 : index
    %c0_31 = arith.constant 0 : index
    %38 = vector.load %arg2[%c448, %c0_31] : memref<576x64xbf16, #tpu.memory_space<vmem>>, vector<64x64xbf16>
    %cst_32 = arith.constant dense<0.000000e+00> : vector<88x64xf32>
    %39 = tpu.matmul %37, %38, %cst_32 {dimension_numbers = #tpu.dot_dimension_numbers<[1], [0], [0], [1], [0, 0, 1, 1], [], []>} : vector<88x64xbf16>, vector<64x64xbf16>, vector<88x64xf32> -> vector<88x64xf32>
    %40 = arith.addf %35, %39 : vector<88x64xf32>
    %c0_33 = arith.constant 0 : index
    %c24 = arith.constant 24 : index
    %c0_34 = arith.constant 0 : index
    %41 = vector.load %arg1[%c0_33, %c24, %c0_34] : memref<1x112x64xbf16, #tpu.memory_space<vmem>>, vector<1x88x64xbf16>
    %42 = vector.shape_cast %41 : vector<1x88x64xbf16> to vector<88x64xbf16>
    %c512 = arith.constant 512 : index
    %c0_35 = arith.constant 0 : index
    %43 = vector.load %arg2[%c512, %c0_35] : memref<576x64xbf16, #tpu.memory_space<vmem>>, vector<64x64xbf16>
    %cst_36 = arith.constant dense<0.000000e+00> : vector<88x64xf32>
    %44 = tpu.matmul %42, %43, %cst_36 {dimension_numbers = #tpu.dot_dimension_numbers<[1], [0], [0], [1], [0, 0, 1, 1], [], []>} : vector<88x64xbf16>, vector<64x64xbf16>, vector<88x64xf32> -> vector<88x64xf32>
    %45 = arith.addf %40, %44 : vector<88x64xf32>
    %c0_37 = arith.constant 0 : index
    %c0_38 = arith.constant 0 : index
    %46 = vector.load %arg3[%c0_37, %c0_38] : memref<1x64xf32, #tpu.memory_space<vmem>>, vector<1x64xf32>
    %47 = vector.broadcast %46 : vector<1x64xf32> to vector<88x64xf32>
    %48 = arith.addf %45, %47 : vector<88x64xf32>
    %49 = arith.truncf %48 : vector<88x64xf32> to vector<88x64xbf16>
    %c0_39 = arith.constant 0 : index
    %c0_40 = arith.constant 0 : index
    %c0_41 = arith.constant 0 : index
    %50 = vector.load %arg4[%c0_39, %c0_40, %c0_41] : memref<1x88x64xbf16, #tpu.memory_space<vmem>>, vector<1x88x64xbf16>
    %51 = vector.shape_cast %50 : vector<1x88x64xbf16> to vector<88x64xbf16>
    %52 = vector.shape_cast %49 : vector<88x64xbf16> to vector<1x88x64xbf16>
    tpu.vector_store %arg4[%c0_39, %c0_40, %c0_41], %52 {strides = array<i32>} : memref<1x88x64xbf16, #tpu.memory_space<vmem>>, vector<1x88x64xbf16>,
    return
  }
  func.func @transform_0(%arg0: i32) -> (i32, i32, i32) {
    %c0_i32 = arith.constant 0 : i32
    %c0_i32_0 = arith.constant 0 : i32
    %c0_i32_1 = arith.constant 0 : i32
    return %arg0, %c0_i32, %c0_i32_0 : i32, i32, i32
  }
  func.func @transform_1(%arg0: i32) -> (i32, i32) {
    %c0_i32 = arith.constant 0 : i32
    %c0_i32_0 = arith.constant 0 : i32
    %c0_i32_1 = arith.constant 0 : i32
    return %c0_i32, %c0_i32_0 : i32, i32
  }
  func.func @transform_2(%arg0: i32) -> (i32, i32) {
    %c0_i32 = arith.constant 0 : i32
    %c0_i32_0 = arith.constant 0 : i32
    %c0_i32_1 = arith.constant 0 : i32
    return %c0_i32, %c0_i32_0 : i32, i32
  }
  func.func @transform_3(%arg0: i32) -> (i32, i32, i32) {
    %c0_i32 = arith.constant 0 : i32
    %c0_i32_0 = arith.constant 0 : i32
    %c0_i32_1 = arith.constant 0 : i32
    return %arg0, %c0_i32, %c0_i32_0 : i32, i32, i32
  }
}

</mosaic_0001>

<bundles_post_ra>
// kernel: tpu_custom_call.1
= control target key start
LH: loop header
LB: loop body
LE: loop exit
PB: predicated region body
PF: predicated region fallthrough
CT: control target
= control target key end

     0   :  { %s1887_s12 = smov 0   ;;  %s2386_s0 = inlined_call_operand.vmem [shape: bf16[2,112,64], index: 0, kind: input, shape index: {}]   ;;  %s2387_s1 = inlined_call_operand.vmem [shape: bf16[576,64], index: 1, kind: input, shape index: {}]   ;;  %s2388_s2 = inlined_call_operand.vmem [shape: f32[1,64], index: 2, kind: input, shape index: {}]   ;;  %s2389_s3 = inlined_call_operand.vmem [shape: bf16[2,88,64], index: 3, kind: output, shape index: {}]  }
   0x1 LB: > { %s1505_s13 = sadd.s32 4294967295, %s1865_s12   ;;  %p1509_p0 = scmp.ge.s32.totalorder %s1865_s12, 1  ;;  %s1865_s12 = sphi %s1887_s12, %s13_s12  }
   0x2   : > { %p137_p1 = scmp.lt.s32.totalorder %s1865_s12, 3 }
   0x4   : > { %p138_p2 = pnand %p1509_p0, %p137_p1 }
   0x5   : > { %p161_p3 = scmp.lt.s32.totalorder (!%p138_p2), %s1505_s13, 1 }
   0x6   : > { %141 = sbr.rel (%p138_p2) target bundleno = 378 (0x17a), region = 32 }
   0xb   : > { %v1755_v0 = vld [vmem:[%s2387_s1 + $0x38] sm:$0xff]  ;;  %v1754_v1 = vld [vmem:[%s2387_s1 + $0x30] sm:$0xff]  ;;  %s2391_s13 = smov (!%p161_p3, %s1505_s13), 1  ;;  %v1753_v2 = vld [vmem:[%s2387_s1 + $0x28] sm:$0xff]  ;;  %vm230_vm0 = vsmask.f32 7424 }
   0xc   : > { %1836 = vmatpush.bf16.msra.mxu1 %v1755_v0  ;;  %1837 = vmatpush.bf16.msra.mxu2 %v1755_v0  ;;  %s1848_s18 = smul.u32 56, %s2391_s13  ;;  %v1752_v13 = vld [vmem:[%s2387_s1 + $0x20] sm:$0xff]  ;;  %v1759_v16 = vld [vmem:[%s2387_s1 + $0x58] sm:$0xff]  ;;  %vm302_vm1 = vcmask 523264   ;;  %v1758_v39 = vld [vmem:[%s2387_s1 + $0x50] sm:$0xff]  ;;  %vm757_vm3 = vcmask 1045504  }
   0xd   : > { %1838 = vmatpush.bf16.msra.mxu3 %v1755_v0  ;;  %325 = vmatpush.bf16.msra.mxu0 %v1755_v0  ;;  %v1751_v23 = vld [vmem:[%s2387_s1 + $0x18] sm:$0xff]  ;;  %v1750_v40 = vld [vmem:[%s2387_s1 + $0x10] sm:$0xff]  ;;  %v1757_v51 = vld [vmem:[%s2387_s1 + $0x48] sm:$0xff]  ;;  %vm600_vm2 = vsmask.f32 6400  ;;  %vm447_vm4 = vcmask 1046528  }
   0xe   : > { %s1910_s23 = scalar_lea.vmem %s2386_s0, %s1848_s18  ;;  %v1767_v34 = vld [vmem:[%s2387_s1 + $0x78] sm:$0xff]  ;;  %v1766_v47 = vld [vmem:[%s2387_s1 + $0x70] sm:$0xff]  ;;  %v1749_v53 = vld [vmem:[%s2387_s1 + $0x8] sm:$0xff]  ;;  %vm1162_vm5 = vsmask.f32 4352  ;;  %vm1047_vm7 = vcmask 1044480  }
   0xf   : > { %v1913_v3 = vld [vmem:[%s1910_s23 + $0x8] sm:$0xff]  ;;  %v1916_v4 = vld [vmem:[%s1910_s23 + $0x10] sm:$0xff]  ;;  %v1919_v5 = vld [vmem:[%s1910_s23 + $0x18] sm:$0xff]  ;;  %vm872_vm6 = vsmask.f32 5376  ;;  %s1849_s18 = smul.u32 44, %s2391_s13 }
  0x10   : > { %1839 = vmatpush.bf16.msra.mxu1 %v1754_v1  ;;  %1840 = vmatpush.bf16.msra.mxu2 %v1754_v1  ;;  %v1922_v6 = vld [vmem:[%s1910_s23 + $0x20] sm:$0xff]  ;;  %v1925_v7 = vld [vmem:[%s1910_s23 + $0x28] sm:$0xff]   ;;  %v239_v9 = vshll.u32 %v1913_v3, 16  ;;  %v243_v10 = vshrl.u32 %v1913_v3, 16  ;;  %v247_v11 = vshll.u32 %v1916_v4, 16  ;;  %v255_v12 = vshll.u32 %v1919_v5, 16 }
  0x11   : > { %1841 = vmatpush.bf16.msra.mxu3 %v1754_v1  ;;  %326 = vmatpush.bf16.msra.mxu0 %v1754_v1  ;;  %v191_v8 = vld [vmem:[%s1910_s23 + $0x2c] sm:$0x1]  ;;  %v259_v14 = vshrl.u32 %v1919_v5, 16  ;;  %v263_v15 = vshll.u32 %v1922_v6, 16  ;;  %v1941_v17 = vunpack.c.l.b16 %v1925_v7  ;;  %v1944_v19 = vld [vmem:[%s1910_s23] sm:$0xff]   ;;  %v1771_v35 = vld [vmem:[%s2387_s1 + $0x98] sm:$0xff]  ;;  %s2340_s21 = scalar_lea.vmem %s2389_s3, %s1849_s18 }
  0x12   : > { %v223_v18 = vunpack.c.l.b16 %v191_v8  ;;  %v241_v20 = vrot.slane %v239_v9, 1  ;;  %v1946_v21 = vrot.slane %v247_v11, 1  ;;  %v1948_v22 = vrot.slane %v255_v12, 1  ;;  %v550_v24 = vld [vmem:[%s1910_s23 + $0x4] sm:$0xe]  ;;  %v1963_v31 = vld [vmem:[%s1910_s23 + $0x8] sm:$0xff]  }
  0x13   : > { %v1954_v25 = vrot.slane %v263_v15, 1  ;;  %v232_v29 = vshrl.u32 %v1944_v19, 16  ;;  %v234_v30 = vshll.u32 %v1944_v19, 16  ;;  %v582_v36 = vunpack.c.l.b16 %v550_v24  ;;  %v1984_v43 = vld [vmem:[%s1910_s23 + $0xc] sm:$0xff]  ;;  %v745_v50 = vld [vmem:[%s1910_s23 + $0x4] sm:$0xc] }
  0x14   : > { %1842 = vmatpush.bf16.msra.mxu1 %v1753_v2  ;;  %1843 = vmatpush.bf16.msra.mxu2 %v1753_v2  ;;  %v1957_v26 = vpack.c.b16 %v223_v18, %v1941_v17  ;;  %v245_v27 = vor.u32 %v243_v10, %v241_v20  ;;  %v261_v28 = vor.u32 %v259_v14, %v1948_v22  ;;  %v583_v44 = vunpack.c.l.b16 %v1963_v31  ;;  %v1770_v48 = vld [vmem:[%s2387_s1 + $0x90] sm:$0xff]  ;;  %v1765_v61 = vld [vmem:[%s2387_s1 + $0x68] sm:$0xff]  ;;  %v1756_v63 = vld [vmem:[%s2387_s1 + $0x40] sm:$0xff] }
  0x15   : > { %1844 = vmatpush.bf16.msra.mxu3 %v1753_v2  ;;  %327 = vmatpush.bf16.msra.mxu0 %v1753_v2  ;;  %v236_v41 = vrot.slane %v234_v30, 1  ;;  %v610_v54 = vshrl.u32 %v1984_v43, 16  ;;  %v613_v57 = vshll.u32 %v1984_v43, 16  ;;  %v755_v58 = vunpack.c.l.b16 %v745_v50  ;;  %v1769_v62 = vld [vmem:[%s2387_s1 + $0x88] sm:$0xff]  ;;  %v1748_v0 = vld [vmem:[%s2387_s1] sm:$0xff]  ;;  %v1779_v2 = vld [vmem:[%s2387_s1 + $0xd8] sm:$0xff] }
  0x16   : > { %v271_v32 = vshll.u32 %v1957_v26, 16  ;;  %v275_v33 = vshrl.u32 %v1957_v26, 16  ;;  %v250_v37 = vsel %vm230_vm0, %v245_v27, %v1946_v21  ;;  %v266_v38 = vsel %vm230_vm0, %v261_v28, %v1954_v25  ;;  %v1775_v8 = vld [vmem:[%s2387_s1 + $0xb8] sm:$0xff]  ;;  %v1764_v15 = vld [vmem:[%s2387_s1 + $0x60] sm:$0xff] }
  0x17   : > { %v237_v45 = vor.u32 %v236_v41, %v232_v29  ;;  %v594_v49 = vpack.c.b16 %v583_v44, %v582_v36  ;;  %v251_v59 = vshrl.u32 %v1916_v4, 16  ;;  %v267_v60 = vshrl.u32 %v1922_v6, 16  ;;  %v1783_v18 = vld [vmem:[%s2387_s1 + $0xf8] sm:$0xff]  ;;  %v1774_v36 = vld [vmem:[%s2387_s1 + $0xb0] sm:$0xff] }
  0x18   : > { %1845 = vmatpush.bf16.msra.mxu1 %v1752_v13  ;;  %1846 = vmatpush.bf16.msra.mxu2 %v1752_v13  ;;  %v273_v42 = vrot.slane %v271_v32, 1  ;;  %v612_v1 = vrot.slane %v610_v54, 1  ;;  %v615_v11 = vrot.slane %v613_v57, 2  ;;  %v2031_v12 = vpack.c.b16 %v583_v44, %v755_v58  ;;  %v2057_v32 = vld [vmem:[%s1910_s23 + $0x14] sm:$0xff]  ;;  %v2087_v50 = vld [vmem:[%s1910_s23 + $0x1c] sm:$0xff] }
  0x19   : > { %1847 = vmatpush.bf16.msra.mxu3 %v1752_v13  ;;  %328 = vmatpush.bf16.msra.mxu0 %v1752_v13  ;;  %v242_v52 = vsel %vm230_vm0, %v237_v45, %v241_v20  ;;  %v602_v55 = vshrl.u32 %v594_v49, 16  ;;  %v605_v56 = vshll.u32 %v594_v49, 16  ;;  %v253_v13 = vor.u32 %v251_v59, %v1946_v21  ;;  %v1787_v20 = vld [vmem:[%s2387_s1 + $0x118] sm:$0xff] }
  0x1a   : > { %v277_v46 = vor.u32 %v275_v33, %v273_v42  ;;  %v269_v14 = vor.u32 %v267_v60, %v1954_v25  ;;  %v758_v24 = vrot.slane %v2031_v12, 2  ;;  %v759_v25 = vrot.slane %v1984_v43, 2  ;;  %v1808_v33 = vld [vmem:[%s1910_s23] sm:$0xf0] }
  0x1b   : > { %1545 = vmatmul.msk.bf16.vlgmr.msra.gmra.mxu1 %vm302_vm1, %v250_v37  ;;  %1547 = vmatmul.msk.bf16.vlgmr.msra.gmra.mxu2 %vm302_vm1, %v266_v38  ;;  %v604_v9 = vrot.slane %v602_v55, 1  ;;  %v607_v10 = vrot.slane %v605_v56, 2  ;;  %v258_v27 = vsel %vm230_vm0, %v253_v13, %v1948_v22  ;;  %v1778_v22 = vld [vmem:[%s2387_s1 + $0xd0] sm:$0xff]  ;;  %v619_v37 = vshrl.u32 %v2057_v32, 16 }
  0x1c   : > { %505 = vmatpush.bf16.msrb.mxu2 %v1759_v16  ;;  %401 = vmatpush.bf16.msrb.mxu1 %v1751_v23  ;;  %v1768_v16 = vld [vmem:[%s2387_s1 + $0x80] sm:$0xff]  ;;  %v616_v23 = vor.u32 %v615_v11, %v612_v1  ;;  %v274_v28 = vsel %vm230_vm0, %v269_v14, %v273_v42  ;;  %v760_v30 = vsel %vm757_vm3, %v758_v24, %v759_v25  ;;  %v622_v38 = vshll.u32 %v2057_v32, 16  ;;  %v1781_v1 = vld [vmem:[%s2387_s1 + $0xe8] sm:$0xff]  ;;  %v561_v14 = vld [vmem:[%s1910_s23 + $0x30] sm:$0x3] }
  0x1d   : > { %700 = vmatpush.bf16.msrb.mxu3 %v1767_v34  ;;  %815 = vmatpush.bf16.msrb.mxu0 %v1771_v35  ;;  %v608_v21 = vor.u32 %v607_v10, %v604_v9  ;;  %v1809_v34 = vld [vmem:[%s1910_s23] sm:$0xe]  ;;  %v1782_v35 = vld [vmem:[%s2387_s1 + $0xf0] sm:$0xff]  ;;  %v449_v44 = vrot.slane %v1913_v3, 1  ;;  %v451_v56 = vrot.slane %v1916_v4, 1  ;;  %v763_v59 = vrot.slane %v2087_v50, 2 }
  0x1e   : > { %1549 = vmatmul.msk.bf16.vlgmr.msra.gmra.mxu3 %vm302_vm1, %v277_v46  ;;  %1544 = vmatmul.msk.bf16.vlgmr.msra.gmra.mxu0 %vm302_vm1, %v242_v52  ;;  %v624_v41 = vrot.slane %v622_v38, 2  ;;  %v761_v46 = vrot.slane %v2057_v32, 2  ;;  %v631_v52 = vshll.u32 %v2087_v50, 16  ;;  %v453_v13 = vrot.slane %v1919_v5, 1 }
  0x1f   : > { %v617_v29 = vsel %vm600_vm2, %v608_v21, %v616_v23  ;;  %v452_v60 = vsel %vm447_vm4, %v449_v44, %v451_v56  ;;  %v457_v24 = vrot.slane %v1957_v26, 1  ;;  %v1772_v26 = vld [vmem:[%s2387_s1 + $0xa0] sm:$0xff]  ;;  %vm1438_vm8 = vcmask 519168  }
  0x20   : > { %506 = vmatpush.bf16.msrb.mxu2 %v1758_v39  ;;  %402 = vmatpush.bf16.msrb.mxu1 %v1750_v40  ;;  %v1810_v39 = vor.u32 %v1809_v34, %v1808_v33  ;;  %v621_v40 = vrot.slane %v619_v37, 1  ;;  %v762_v49 = vsel %vm757_vm3, %v759_v25, %v761_v46  ;;  %v633_v55 = vrot.slane %v631_v52, 2 }
  0x21   : > { %701 = vmatpush.bf16.msrb.mxu3 %v1766_v47  ;;  %816 = vmatpush.bf16.msrb.mxu0 %v1770_v48  ;;  %v454_v21 = vsel %vm447_vm4, %v451_v56, %v453_v13 }
  0x22   : > { %v448_v42 = vrot.slane %v1810_v39, 1  ;;  %v625_v45 = vor.u32 %v624_v41, %v621_v40 }
  0x24   : > { %507 = vmatpush.bf16.msrb.mxu2 %v1757_v51  ;;  %403 = vmatpush.bf16.msrb.mxu1 %v1749_v53  ;;  %v450_v47 = vsel %vm447_vm4, %v448_v42, %v449_v44  ;;  %v626_v48 = vsel %vm600_vm2, %v616_v23, %v625_v45  ;;  %v1786_v51 = vld [vmem:[%s2387_s1 + $0x110] sm:$0xff]  ;;  %v455_v23 = vrot.slane %v1922_v6, 1  ;;  %v1784_v44 = vld [vmem:[%s2387_s1 + $0x100] sm:$0xff] }
  0x25   : > { %702 = vmatpush.bf16.msrb.mxu3 %v1765_v61  ;;  %817 = vmatpush.bf16.msrb.mxu0 %v1769_v62  ;;  %v2104_v61 = vld [vmem:[%s1910_s23 + $0x24] sm:$0xff] }
  0x26   : > { %v640_v9 = vshll.u32 %v2104_v61, 16  ;;  %v458_v25 = vsel %vm447_vm4, %v455_v23, %v457_v24  ;;  %v456_v40 = vsel %vm447_vm4, %v453_v13, %v455_v23 }
  0x28   : > { %508 = vmatpush.bf16.msrb.mxu2 %v1756_v63  ;;  %404 = vmatpush.bf16.msrb.mxu1 %v1748_v0  ;;  %v764_v63 = vsel %vm757_vm3, %v761_v46, %v763_v59  ;;  %v1777_v0 = vld [vmem:[%s2387_s1 + $0xc8] sm:$0xff]  ;;  %v642_v11 = vrot.slane %v640_v9, 2 }
  0x29   : > { %703 = vmatpush.bf16.msrb.mxu3 %v1764_v15  ;;  %818 = vmatpush.bf16.msrb.mxu0 %v1768_v16  ;;  %v765_v16 = vrot.slane %v2104_v61, 2 }
  0x2b   : > { %1546 = vmatmul.msk.bf16.gmra.mxu1 %vm302_vm1, %v258_v27  ;;  %1548 = vmatmul.msk.bf16.gmra.mxu2 %vm302_vm1, %v274_v28  ;;  %v766_v28 = vsel %vm757_vm3, %v763_v59, %v765_v16 }
  0x2c   : > { %1105 = vmatpush.bf16.msra.mxu2 %v1779_v2  ;;  %952 = vmatpush.bf16.msra.mxu1 %v1775_v8  ;;  %v1773_v2 = vld [vmem:[%s2387_s1 + $0xa8] sm:$0xff]  ;;  %v637_v8 = vshrl.u32 %v2104_v61, 16 }
  0x2d   : > { %1262 = vmatpush.bf16.msra.mxu3 %v1783_v18  ;;  %1367 = vmatpush.bf16.msra.mxu0 %v1787_v20  ;;  %v592_v18 = vunpack.c.h.b16 %v1925_v7  ;;  %v593_v20 = vunpack.c.l.b16 %v561_v14 }
  0x2e   : > { %1626 = vmatmul.msk.bf16.vlgmr.msrb.gmra.mxu3 %vm302_vm1, %v617_v29  ;;  %1648 = vmatmul.msk.bf16.vlgmr.msrb.gmra.mxu0 %vm302_vm1, %v760_v30  ;;  %v639_v10 = vrot.slane %v637_v8, 1  ;;  %v1776_v30 = vld [vmem:[%s2387_s1 + $0xc0] sm:$0xff] }
  0x2f   : > { %v599_v29 = vpack.c.b16 %v593_v20, %v592_v18 }
  0x30   : > { %1106 = vmatpush.bf16.msra.mxu2 %v1778_v22  ;;  %953 = vmatpush.bf16.msra.mxu1 %v1774_v36  ;;  %v643_v15 = vor.u32 %v642_v11, %v639_v10  ;;  %v2189_v10 = vld [vmem:[%s1910_s23 + $0x18] sm:$0xff]  }
  0x31   : > { %1263 = vmatpush.bf16.msra.mxu3 %v1782_v35  ;;  %1368 = vmatpush.bf16.msra.mxu0 %v1786_v51  ;;  %v646_v22 = vshrl.u32 %v599_v29, 16  ;;  %v649_v33 = vshll.u32 %v599_v29, 16  ;;  %v767_v39 = vrot.slane %v599_v29, 2  ;;  %v1184_v11 = vshll.u32 %v2189_v10, 16 }
  0x33   : > { %v648_v34 = vrot.slane %v646_v22, 1  ;;  %v651_v35 = vrot.slane %v649_v33, 2  ;;  %v768_v42 = vsel %vm757_vm3, %v765_v16, %v767_v39  ;;  %v882_v16 = vrot.slane %v613_v57, 3 }
  0x34   : > { %1107 = vmatpush.bf16.msra.mxu2 %v1777_v0  ;;  %954 = vmatpush.bf16.msra.mxu1 %v1773_v2  ;;  %v874_v2 = vshrl.u32 %v2031_v12, 16  ;;  %v1186_v20 = vrot.slane %v1184_v11, 4 }
  0x35   : > { %1264 = vmatpush.bf16.msra.mxu3 %v1781_v1  ;;  %v652_v36 = vor.u32 %v651_v35, %v648_v34  ;;  %v885_v35 = vrot.slane %v619_v37, 2 }
  0x36   : > { %v876_v13 = vrot.slane %v874_v2, 2 }
  0x37   : > { %v653_v41 = vsel %vm600_vm2, %v643_v15, %v652_v36 }
  0x38   : > { %1108 = vmatpush.bf16.msra.mxu2 %v1776_v30  ;;  %955 = vmatpush.bf16.msra.mxu1 %v1772_v26  ;;  %v1832_v30 = vld [vmem:[%s1910_s23 + $0x14] sm:$0xff]  }
  0x3b   : > { %1566 = vmatmul.msk.bf16.vlgmr.msrb.gmra.mxu1 %vm302_vm1, %v1944_v19  ;;  %1588 = vmatmul.msk.bf16.vlgmr.msrb.gmra.mxu2 %vm302_vm1, %v450_v47  ;;  %v628_v19 = vshrl.u32 %v2087_v50, 16  ;;  %v1030_v47 = vunpack.c.h.b16 %v1963_v31 }
  0x3d   : > { %v630_v53 = vrot.slane %v628_v19, 1 }
  0x3e   : > { %1627 = vmatmul.msk.bf16.gmra.mxu3 %vm302_vm1, %v626_v48  ;;  %1649 = vmatmul.msk.bf16.gmra.mxu0 %vm302_vm1, %v762_v49  ;;  %v2174_v48 = vld [vmem:[%s1910_s23 + $0x10] sm:$0xff]  }
  0x3f   : > { %v634_v58 = vor.u32 %v633_v55, %v630_v53  ;;  %v1172_v53 = vshrl.u32 %v2174_v48, 16  ;;  %v1175_v55 = vshll.u32 %v2174_v48, 16  ;;  %v1794_v59 = vunpack.c.l.b16 %v2174_v48 }
  0x41   : > { %v635_v62 = vsel %vm600_vm2, %v625_v45, %v634_v58  ;;  %v644_v27 = vsel %vm600_vm2, %v634_v58, %v643_v15  ;;  %v997_v45 = vld [vmem:[%s1910_s23 + $0x8] sm:$0x8]  ;;  %v1174_v58 = vrot.slane %v1172_v53, 3  ;;  %v1315_v0 = vpack.c.b16 %v1794_v59, %v1030_v47 }
  0x42   : > { %v1029_v46 = vunpack.c.l.b16 %v997_v45  ;;  %v881_v15 = vrot.slane %v610_v54, 2  ;;  %v1051_v45 = vrot.slane %v2189_v10, 3  ;;  %v2237_v53 = vld [vmem:[%s1910_s23 + $0x28] sm:$0xff]   ;;  %v890_v59 = vrot.slane %v631_v52, 3 }
  0x44   : > { %v883_v23 = vor.u32 %v882_v16, %v881_v15  ;;  %v1835_v16 = vld [vmem:[%s1910_s23 + $0x24] sm:$0xff]  }
  0x4b   : > { %1567 = vmatmul.msk.bf16.gmra.mxu1 %vm302_vm1, %v1913_v3  ;;  %1589 = vmatmul.msk.bf16.gmra.mxu2 %vm302_vm1, %v452_v60  ;;  %v1785_v3 = vld [vmem:[%s2387_s1 + $0x108] sm:$0xff]  ;;  %v359_v60 = vpack.c.b16 %v1941_v17, %v1941_v17  ;;  %v1181_v17 = vshrl.u32 %v2189_v10, 16 }
  0x4c   : > { %1369 = vmatpush.bf16.msra.mxu0 %v1785_v3  ;;  %v877_v3 = vshll.u32 %v2031_v12, 16 }
  0x4d   : > { %v1183_v12 = vrot.slane %v1181_v17, 3 }
  0x4e   : > { %1628 = vmatmul.msk.bf16.gmra.mxu3 %vm302_vm1, %v635_v62  ;;  %1650 = vmatmul.msk.bf16.gmra.mxu0 %vm302_vm1, %v764_v63  ;;  %v879_v14 = vrot.slane %v877_v3, 3  ;;  %v2253_v3 = vld [vmem:[%s1910_s23 + $0x30] sm:$0xff]  }
  0x4f   : > { %v1039_v11 = vunpack.c.l.b16 %v2253_v3 }
  0x50   : > { %1370 = vmatpush.bf16.msra.mxu0 %v1784_v44 }
  0x5b   : > { %1568 = vmatmul.msk.bf16.gmra.mxu1 %vm302_vm1, %v1916_v4  ;;  %1590 = vmatmul.msk.bf16.gmra.mxu2 %vm302_vm1, %v454_v21  ;;  %v1780_v4 = vld [vmem:[%s2387_s1 + $0xe0] sm:$0xff]  ;;  %v880_v21 = vor.u32 %v879_v14, %v876_v13 }
  0x5c   : > { %1265 = vmatpush.bf16.msra.mxu3 %v1780_v4  ;;  %v2209_v4 = vld [vmem:[%s1910_s23 + $0x20] sm:$0xff]  }
  0x5d   : > { %v884_v29 = vsel %vm872_vm6, %v880_v21, %v883_v23  ;;  %v1190_v22 = vshrl.u32 %v2209_v4, 16  ;;  %v1193_v33 = vshll.u32 %v2209_v4, 16  ;;  %v1053_v2 = vrot.slane %v2209_v4, 3  ;;  %v860_v4 = vld [vmem:[%s1910_s23 + $0x30] sm:$0x7] }
  0x5e   : > { %1629 = vmatmul.msk.bf16.gmra.mxu3 %vm302_vm1, %v644_v27  ;;  %1651 = vmatmul.msk.bf16.gmra.mxu0 %vm302_vm1, %v766_v28  ;;  %v1187_v27 = vor.u32 %v1186_v20, %v1183_v12 }
  0x5f   : > { %v1054_v52 = vsel %vm1047_vm7, %v1051_v45, %v1053_v2 }
  0x6b   : > { %1569 = vmatmul.msk.bf16.gmra.mxu1 %vm302_vm1, %v1919_v5  ;;  %1591 = vmatmul.msk.bf16.gmra.mxu2 %vm302_vm1, %v456_v40  ;;  %v1041_v5 = vpack.c.b16 %v1030_v47, %v1029_v46 }
  0x6d   : > { %v1164_v49 = vshrl.u32 %v1041_v5, 16  ;;  %v1167_v51 = vshll.u32 %v1041_v5, 16 }
  0x6e   : > { %1630 = vmatmul.msk.bf16.gmra.mxu3 %vm302_vm1, %v653_v41  ;;  %1652 = vmatmul.msk.bf16.gmra.mxu0 %vm302_vm1, %v768_v42  ;;  %v1192_v41 = vrot.slane %v1190_v22, 3  ;;  %v1195_v42 = vrot.slane %v1193_v33, 4 }
  0x6f   : > { %v1166_v31 = vrot.slane %v1164_v49, 3  ;;  %v1169_v56 = vrot.slane %v1167_v51, 4 }
  0x70   : > { %v1196_v47 = vor.u32 %v1195_v42, %v1192_v41  ;;  %v1055_v42 = vrot.slane %v2237_v53, 3 }
  0x71   : > { %v1170_v62 = vor.u32 %v1169_v56, %v1166_v31  ;;  %v1199_v31 = vshrl.u32 %v2237_v53, 16  ;;  %v1202_v56 = vshll.u32 %v2237_v53, 16 }
  0x72   : > { %v1197_v49 = vsel %vm1162_vm5, %v1187_v27, %v1196_v47 }
  0x7b   : > { %1570 = vmatmul.msk.bf16.gmra.mxu1 %vm302_vm1, %v1922_v6  ;;  %1592 = vmatmul.msk.bf16.gmra.mxu2 %vm302_vm1, %v458_v25  ;;  %v1177_v6 = vrot.slane %v1175_v55, 4  ;;  %v1049_v25 = vrot.slane %v2174_v48, 3 }
  0x7d   : > { %v1178_v63 = vor.u32 %v1177_v6, %v1174_v58  ;;  %v1052_v37 = vsel %vm1047_vm7, %v1049_v25, %v1051_v45  ;;  %v889_v6 = vrot.slane %v628_v19, 2  ;;  %v1160_v19 = vunpack.c.h.b16 %v2253_v3 }
  0x7e   : > { %1631 = vmatmul.msk.bf16.gmra.mxu3 %vm302_vm1, %v652_v36  ;;  %1653 = vmatmul.msk.bf16.gmra.mxu0 %vm302_vm1, %v767_v39  ;;  %v886_v36 = vrot.slane %v622_v38, 3  ;;  %v1834_v38 = vld [vmem:[%s1910_s23 + $0x1c] sm:$0xff]  }
  0x7f   : > { %v1179_v1 = vsel %vm1162_vm5, %v1170_v62, %v1178_v63  ;;  %v1188_v43 = vsel %vm1162_vm5, %v1178_v63, %v1187_v27  ;;  %v1201_v63 = vrot.slane %v1199_v31, 3 }
  0x80   : > { %v887_v44 = vor.u32 %v886_v36, %v885_v35 }
  0x82   : > { %v888_v48 = vsel %vm872_vm6, %v883_v23, %v887_v44 }
  0x8b   : > { %1571 = vmatmul.msk.bf16.gmra.mxu1 %vm302_vm1, %v359_v60  ;;  %1593 = vmatmul.msk.bf16.gmra.mxu2 %vm302_vm1, %v457_v24  ;;  %v1048_v24 = vrot.slane %v1041_v5, 3 }
  0x8d   : > { %v1050_v54 = vsel %vm1047_vm7, %v1048_v24, %v1049_v25  ;;  %v1208_v24 = vshrl.u32 %v2253_v3, 16  ;;  %v1211_v25 = vshll.u32 %v2253_v3, 16 }
  0x8e   : > { %1714 = vmatmul.msk.bf16.vlgmr.msra.gmra.mxu3 %vm302_vm1, %v1179_v1  ;;  %1736 = vmatmul.msk.bf16.vlgmr.msra.gmra.mxu0 %vm302_vm1, %v1315_v0  ;;  %v1204_v0 = vrot.slane %v1202_v56, 4  ;;  %v891_v1 = vor.u32 %v890_v59, %v889_v6 }
  0x8f   : > { %v1210_v33 = vrot.slane %v1208_v24, 3  ;;  %v1213_v35 = vrot.slane %v1211_v25, 4 }
  0x90   : > { %v1205_v17 = vor.u32 %v1204_v0, %v1201_v63  ;;  %v892_v50 = vsel %vm872_vm6, %v887_v44, %v891_v1  ;;  %v870_v44 = vunpack.c.l.b16 %v860_v4 }
  0x91   : > { %v1214_v61 = vor.u32 %v1213_v35, %v1210_v33 }
  0x92   : > { %v1206_v12 = vsel %vm1162_vm5, %v1196_v47, %v1205_v17 }
  0x98   : > { %v2200_v28 = vpop.f32.mrf.mxu1 }
  0x9b   : > { %1670 = vmatmul.msk.bf16.vlgmr.msra.gmra.mxu1 %vm302_vm1, %v884_v29  ;;  %1692 = vmatmul.msk.bf16.vlgmr.msra.gmra.mxu2 %vm302_vm1, %v1050_v54  ;;  %v330_v57 = vpop.f32.mrf.mxu0  ;;  %v893_v29 = vrot.slane %v637_v8, 2  ;;  %v894_v54 = vrot.slane %v640_v9, 3  ;;  %v1807_v8 = vunpack.c.h.b16 %v2237_v53  ;;  %v1215_v53 = vsel %vm1162_vm5, %v1205_v17, %v1214_v61 }
  0x9d   : > { %v895_v41 = vor.u32 %v894_v54, %v893_v29  ;;  %v1319_v31 = vpack.c.b16 %v1039_v11, %v1807_v8 }
  0x9e   : > { %v2211_v26 = vpop.f32.mrf.mxu2  ;;  %1715 = vmatmul.msk.bf16.gmra.mxu3 %vm302_vm1, %v1188_v43  ;;  %1737 = vmatmul.msk.bf16.gmra.mxu0 %vm302_vm1, %v1832_v30 }
  0xa0   : > { %v2217_v34 = vpop.f32.mrf.mxu1 }
  0xa1   : > { %v2223_v39 = vpop.f32.mrf.mxu3 }
  0xa3   : > { %v332_v40 = vpop.f32.mrf.mxu0 }
  0xa6   : > { %v2226_v46 = vpop.f32.mrf.mxu2 }
  0xa8   : > { %v2228_v5 = vpop.f32.mrf.mxu1 }
  0xa9   : > { %v357_v32 = vpop.f32.mrf.mxu3 }
  0xab   : > { %1671 = vmatmul.msk.bf16.gmra.mxu1 %vm302_vm1, %v888_v48  ;;  %1693 = vmatmul.msk.bf16.gmra.mxu2 %vm302_vm1, %v1052_v37  ;;  %v820_v51 = vpop.f32.mrf.mxu0  ;;  %v1056_v48 = vsel %vm1047_vm7, %v1053_v2, %v1055_v42  ;;  %v871_v37 = vpack.c.b16 %v870_v44, %v592_v18 }
  0xad   : > { %v898_v59 = vshrl.u32 %v871_v37, 16 }
  0xae   : > { %v2239_v55 = vpop.f32.mrf.mxu2  ;;  %1716 = vmatmul.msk.bf16.gmra.mxu3 %vm302_vm1, %v1197_v49  ;;  %1738 = vmatmul.msk.bf16.gmra.mxu0 %vm302_vm1, %v1834_v38 }
  0xaf   : > { %v900_v0 = vrot.slane %v898_v59, 2 }
  0xb0   : > { %v2245_v58 = vpop.f32.mrf.mxu1 }
  0xb1   : > { %v705_v60 = vpop.f32.mrf.mxu3 }
  0xb3   : > { %v822_v62 = vpop.f32.mrf.mxu0 }
  0xb6   : > { %v2255_v10 = vpop.f32.mrf.mxu2 }
  0xb8   : > { %v406_v13 = vpop.f32.mrf.mxu1 }
  0xb9   : > { %v407_v14 = vadd.f32 %v406_v13, %v330_v57  ;;  %v707_v15 = vpop.f32.mrf.mxu3 }
  0xbb   : > { %1672 = vmatmul.msk.bf16.gmra.mxu1 %vm302_vm1, %v892_v50  ;;  %1694 = vmatmul.msk.bf16.gmra.mxu2 %vm302_vm1, %v1054_v52  ;;  %v825_v20 = vpop.f32.mrf.mxu0 }
  0xbe   : > { %v510_v21 = vpop.f32.mrf.mxu2  ;;  %1717 = vmatmul.msk.bf16.gmra.mxu3 %vm302_vm1, %v1206_v12  ;;  %1739 = vmatmul.msk.bf16.gmra.mxu0 %vm302_vm1, %v1835_v16 }
  0xbf   : > { %v539_v23 = vadd.f32 %v510_v21, %v407_v14 }
  0xc0   : > { %v408_v27 = vpop.f32.mrf.mxu1 }
  0xc1   : > { %v734_v30 = vadd.f32 %v705_v60, %v539_v23  ;;  %v409_v43 = vadd.f32 %v408_v27, %v332_v40  ;;  %v710_v57 = vpop.f32.mrf.mxu3  ;;  %v896_v40 = vsel %vm872_vm6, %v891_v1, %v895_v41  ;;  %v901_v60 = vshll.u32 %v871_v37, 16 }
  0xc3   : > { %v827_v22 = vpop.f32.mrf.mxu0  ;;  %v2274_v36 = vadd.f32 %v820_v51, %v734_v30  ;;  %v1008_v51 = vld [vmem:[%s1910_s23 + $0x34] sm:$0x7]  ;;  %v903_v1 = vrot.slane %v901_v60, 3 }
  0xc4   : > { %v1040_v63 = vunpack.c.l.b16 %v1008_v51 }
  0xc5   : > { %v904_v14 = vor.u32 %v903_v1, %v900_v0 }
  0xc6   : > { %v512_v45 = vpop.f32.mrf.mxu2  ;;  %v1046_v2 = vpack.c.b16 %v1040_v63, %v1039_v11 }
  0xc7   : > { %v540_v47 = vadd.f32 %v512_v45, %v409_v43  ;;  %v905_v23 = vsel %vm872_vm6, %v895_v41, %v904_v14 }
  0xc8   : > { %v411_v9 = vpop.f32.mrf.mxu1 }
  0xc9   : > { %v735_v32 = vadd.f32 %v707_v15, %v540_v47  ;;  %v412_v38 = vadd.f32 %v411_v9, %v2200_v28  ;;  %v712_v49 = vpop.f32.mrf.mxu3  ;;  %v1057_v15 = vrot.slane %v1046_v2, 3 }
  0xcb   : > { %1673 = vmatmul.msk.bf16.gmra.mxu1 %vm302_vm1, %v896_v40  ;;  %1695 = vmatmul.msk.bf16.gmra.mxu2 %vm302_vm1, %v1056_v48  ;;  %v830_v56 = vpop.f32.mrf.mxu0  ;;  %v2287_v6 = vadd.f32 %v822_v62, %v735_v32  ;;  %v1058_v24 = vsel %vm1047_vm7, %v1055_v42, %v1057_v15 }
  0xce   : > { %v515_v7 = vpop.f32.mrf.mxu2  ;;  %1718 = vmatmul.msk.bf16.gmra.mxu3 %vm302_vm1, %v1215_v53  ;;  %1740 = vmatmul.msk.bf16.gmra.mxu0 %vm302_vm1, %v1319_v31 }
  0xcf   : > { %v541_v18 = vadd.f32 %v515_v7, %v412_v38 }
  0xd0   : > { %v413_v28 = vpop.f32.mrf.mxu1 }
  0xd1   : > { %v736_v13 = vadd.f32 %v710_v57, %v541_v18  ;;  %v414_v50 = vadd.f32 %v413_v28, %v2217_v34  ;;  %v715_v17 = vpop.f32.mrf.mxu3  ;;  %v1320_v34 = vpack.c.b16 %v1160_v19, %v1160_v19 }
  0xd3   : > { %v832_v52 = vpop.f32.mrf.mxu0  ;;  %v2292_v62 = vadd.f32 %v825_v20, %v736_v13 }
  0xd6   : > { %v517_v16 = vpop.f32.mrf.mxu2 }
  0xd7   : > { %v542_v12 = vadd.f32 %v517_v16, %v414_v50 }
  0xd8   : > { %v416_v21 = vpop.f32.mrf.mxu1 }
  0xd9   : > { %v737_v25 = vadd.f32 %v712_v49, %v542_v12  ;;  %v417_v27 = vadd.f32 %v416_v21, %v2228_v5  ;;  %v717_v11 = vpop.f32.mrf.mxu3 }
  0xdb   : > { %1674 = vmatmul.msk.bf16.gmra.mxu1 %vm302_vm1, %v905_v23  ;;  %1696 = vmatmul.msk.bf16.gmra.mxu2 %vm302_vm1, %v1058_v24  ;;  %v835_v20 = vpop.f32.mrf.mxu0  ;;  %v2302_v29 = vadd.f32 %v827_v22, %v737_v25 }
  0xde   : > { %v520_v54 = vpop.f32.mrf.mxu2  ;;  %1719 = vmatmul.msk.bf16.gmra.mxu3 %vm302_vm1, %v1214_v61  ;;  %1741 = vmatmul.msk.bf16.gmra.mxu0 %vm302_vm1, %v1320_v34 }
  0xdf   : > { %v543_v30 = vadd.f32 %v520_v54, %v417_v27 }
  0xe0   : > { %v418_v43 = vpop.f32.mrf.mxu1 }
  0xe1   : > { %v738_v5 = vadd.f32 %v715_v17, %v543_v30  ;;  %v419_v57 = vadd.f32 %v418_v43, %v2245_v58  ;;  %v720_v3 = vpop.f32.mrf.mxu3 }
  0xe3   : > { %v837_v4 = vpop.f32.mrf.mxu0  ;;  %v2307_v19 = vadd.f32 %v830_v56, %v738_v5 }
  0xe6   : > { %v522_v33 = vpop.f32.mrf.mxu2 }
  0xe7   : > { %v544_v35 = vadd.f32 %v522_v33, %v419_v57 }
  0xe8   : > { %v421_v41 = vpop.f32.mrf.mxu1 }
  0xe9   : > { %v739_v42 = vadd.f32 %v717_v11, %v544_v35  ;;  %v722_v22 = vpop.f32.mrf.mxu3  ;;  %v422_v8 = vadd.f32 %v421_v41, %v2211_v26 }
  0xeb   : > { %1675 = vmatmul.msk.bf16.gmra.mxu1 %vm302_vm1, %v904_v14  ;;  %1697 = vmatmul.msk.bf16.gmra.mxu2 %vm302_vm1, %v1057_v15  ;;  %v840_v44 = vpop.f32.mrf.mxu0  ;;  %v2311_v45 = vadd.f32 %v832_v52, %v739_v42 }
  0xee   : > { %v525_v47 = vpop.f32.mrf.mxu2 }
  0xef   : > { %v545_v58 = vadd.f32 %v525_v47, %v422_v8 }
  0xf0   : > { %v423_v61 = vpop.f32.mrf.mxu1 }
  0xf1   : > { %v740_v9 = vadd.f32 %v720_v3, %v545_v58  ;;  %v725_v40 = vpop.f32.mrf.mxu3  ;;  %v424_v32 = vadd.f32 %v423_v61, %v2226_v46 }
  0xf3   : > { %v842_v48 = vpop.f32.mrf.mxu0  ;;  %v2314_v37 = vadd.f32 %v835_v20, %v740_v9 }
  0xf6   : > { %v527_v38 = vpop.f32.mrf.mxu2 }
  0xf7   : > { %v546_v49 = vadd.f32 %v527_v38, %v424_v32 }
  0xf8   : > { %v426_v51 = vpop.f32.mrf.mxu1 }
  0xf9   : > { %v741_v31 = vadd.f32 %v722_v22, %v546_v49  ;;  %v727_v53 = vpop.f32.mrf.mxu3  ;;  %v427_v26 = vadd.f32 %v426_v51, %v2239_v55 }
  0xfb   : > { %v845_v56 = vpop.f32.mrf.mxu0  ;;  %v2317_v59 = vadd.f32 %v837_v4, %v741_v31 }
  0xfe   : > { %v530_v60 = vpop.f32.mrf.mxu2 }
  0xff   : > { %v547_v63 = vadd.f32 %v530_v60, %v427_v26 }
 0x100   : > { %v428_v7 = vpop.f32.mrf.mxu1 }
 0x101   : > { %v742_v18 = vadd.f32 %v725_v40, %v547_v63  ;;  %v730_v28 = vpop.f32.mrf.mxu3  ;;  %v429_v46 = vadd.f32 %v428_v7, %v2255_v10 }
 0x103   : > { %v847_v0 = vpop.f32.mrf.mxu0  ;;  %v2320_v1 = vadd.f32 %v840_v44, %v742_v18 }
 0x106   : > { %v532_v2 = vpop.f32.mrf.mxu2 }
 0x107   : > { %v548_v13 = vadd.f32 %v532_v2, %v429_v46 }
 0x108   : > { %v431_v50 = vpop.f32.mrf.mxu1 }
 0x109   : > { %v743_v17 = vadd.f32 %v727_v53, %v548_v13  ;;  %v732_v52 = vpop.f32.mrf.mxu3  ;;  %v432_v55 = vadd.f32 %v431_v50, %v2223_v39  ;;  %v2332_v39 = vld [vmem:[%s2388_s2] ss:$0 sm:$0xff] }
 0x10b   : > { %v1372_v14 = vpop.f32.mrf.mxu0  ;;  %v2323_v15 = vadd.f32 %v842_v48, %v743_v17 }
 0x10e   : > { %v535_v16 = vpop.f32.mrf.mxu2 }
 0x10f   : > { %v549_v12 = vadd.f32 %v535_v16, %v432_v55 }
 0x110   : > { %v433_v21 = vpop.f32.mrf.mxu1 }
 0x111   : > { %v744_v23 = vadd.f32 %v730_v28, %v549_v12  ;;  %v1267_v24 = vpop.f32.mrf.mxu3 }
 0x113   : > { %v1374_v25 = vpop.f32.mrf.mxu0  ;;  %v2326_v27 = vadd.f32 %v845_v56, %v744_v23 }
 0x116   : > { %v537_v10 = vpop.f32.mrf.mxu2 }
 0x118   : > { %v957_v11 = vpop.f32.mrf.mxu1 }
 0x119   : > { %v1269_v34 = vpop.f32.mrf.mxu3  ;;  %v986_v54 = vadd.f32 %v957_v11, %v2274_v36 }
 0x11b   : > { %v1377_v20 = vpop.f32.mrf.mxu0 }
 0x11e   : > { %v1110_v30 = vpop.f32.mrf.mxu2 }
 0x11f   : > { %v1139_v43 = vadd.f32 %v1110_v30, %v986_v54 }
 0x120   : > { %v959_v5 = vpop.f32.mrf.mxu1 }
 0x121   : > { %v1296_v57 = vadd.f32 %v1267_v24, %v1139_v43  ;;  %v1272_v3 = vpop.f32.mrf.mxu3  ;;  %v987_v41 = vadd.f32 %v959_v5, %v2287_v6 }
 0x123   : > { %v1401_v4 = vadd.f32 %v1372_v14, %v1296_v57  ;;  %v1379_v33 = vpop.f32.mrf.mxu0 }
 0x125   : > { %v1416_v35 = vadd.f32 %v2332_v39, %v1401_v4 }
 0x126   : > { %v1112_v36 = vpop.f32.mrf.mxu2 }
 0x127   : > { %v1427_v42 = vpack.c.bf16 %v1416_v35, %v1416_v35  ;;  %v1140_v22 = vadd.f32 %v1112_v36, %v987_v41 }
 0x128   : > { %v962_v44 = vpop.f32.mrf.mxu1 }
 0x129   : > { %1439 = vst.msk [vmem:[%s2340_s21] sm:$0xf] %vm1438_vm8, %v1427_v42  ;;  %v1297_v8 = vadd.f32 %v1269_v34, %v1140_v22  ;;  %v1274_v47 = vpop.f32.mrf.mxu3  ;;  %v988_v9 = vadd.f32 %v962_v44, %v2292_v62 }
 0x12b   : > { %v1402_v58 = vadd.f32 %v1374_v25, %v1297_v8  ;;  %v1382_v61 = vpop.f32.mrf.mxu0 }
 0x12d   : > { %v1417_v6 = vadd.f32 %v2332_v39, %v1402_v58 }
 0x12e   : > { %v1115_v40 = vpop.f32.mrf.mxu2 }
 0x12f   : > { %v1428_v48 = vpack.c.bf16 %v1417_v6, %v1417_v6  ;;  %v1141_v32 = vadd.f32 %v1115_v40, %v988_v9 }
 0x130   : > { %v964_v38 = vpop.f32.mrf.mxu1 }
 0x131   : > { %1440 = vst.msk [vmem:[%s2340_s21 + $0x4] sm:$0xf] %vm1438_vm8, %v1428_v48  ;;  %v1298_v49 = vadd.f32 %v1272_v3, %v1141_v32  ;;  %v1277_v51 = vpop.f32.mrf.mxu3  ;;  %v989_v26 = vadd.f32 %v964_v38, %v2302_v29 }
 0x133   : > { %v1403_v31 = vadd.f32 %v1377_v20, %v1298_v49  ;;  %v1384_v53 = vpop.f32.mrf.mxu0 }
 0x135   : > { %v1418_v56 = vadd.f32 %v2332_v39, %v1403_v31 }
 0x136   : > { %v1117_v60 = vpop.f32.mrf.mxu2 }
 0x137   : > { %v1429_v63 = vpack.c.bf16 %v1418_v56, %v1418_v56  ;;  %v1142_v7 = vadd.f32 %v1117_v60, %v989_v26 }
 0x138   : > { %v967_v62 = vpop.f32.mrf.mxu1 }
 0x139   : > { %1441 = vst.msk [vmem:[%s2340_s21 + $0x8] sm:$0xf] %vm1438_vm8, %v1429_v63  ;;  %v1299_v18 = vadd.f32 %v1274_v47, %v1142_v7  ;;  %v1279_v28 = vpop.f32.mrf.mxu3  ;;  %v990_v13 = vadd.f32 %v967_v62, %v2307_v19 }
 0x13b   : > { %v1404_v0 = vadd.f32 %v1379_v33, %v1299_v18  ;;  %v1387_v46 = vpop.f32.mrf.mxu0 }
 0x13d   : > { %v1419_v2 = vadd.f32 %v2332_v39, %v1404_v0 }
 0x13e   : > { %v1120_v50 = vpop.f32.mrf.mxu2 }
 0x13f   : > { %v1430_v17 = vpack.c.bf16 %v1419_v2, %v1419_v2  ;;  %v1143_v52 = vadd.f32 %v1120_v50, %v990_v13 }
 0x140   : > { %v969_v29 = vpop.f32.mrf.mxu1 }
 0x141   : > { %1442 = vst.msk [vmem:[%s2340_s21 + $0xc] sm:$0xf] %vm1438_vm8, %v1430_v17  ;;  %v1300_v14 = vadd.f32 %v1277_v51, %v1143_v52  ;;  %v1282_v55 = vpop.f32.mrf.mxu3  ;;  %v991_v23 = vadd.f32 %v969_v29, %v2311_v45 }
 0x143   : > { %v1405_v16 = vadd.f32 %v1382_v61, %v1300_v14  ;;  %v1389_v12 = vpop.f32.mrf.mxu0 }
 0x145   : > { %v1420_v21 = vadd.f32 %v2332_v39, %v1405_v16 }
 0x146   : > { %v1122_v24 = vpop.f32.mrf.mxu2 }
 0x147   : > { %v1431_v25 = vpack.c.bf16 %v1420_v21, %v1420_v21  ;;  %v1144_v10 = vadd.f32 %v1122_v24, %v991_v23 }
 0x148   : > { %v972_v19 = vpop.f32.mrf.mxu1 }
 0x149   : > { %1443 = vst.msk [vmem:[%s2340_s21 + $0x10] sm:$0xf] %vm1438_vm8, %v1431_v25  ;;  %v1301_v11 = vadd.f32 %v1279_v28, %v1144_v10  ;;  %v1284_v34 = vpop.f32.mrf.mxu3  ;;  %v992_v43 = vadd.f32 %v972_v19, %v2314_v37 }
 0x14b   : > { %v1406_v20 = vadd.f32 %v1384_v53, %v1301_v11  ;;  %v1392_v54 = vpop.f32.mrf.mxu0 }
 0x14d   : > { %v1421_v30 = vadd.f32 %v2332_v39, %v1406_v20 }
 0x14e   : > { %v1125_v5 = vpop.f32.mrf.mxu2 }
 0x14f   : > { %v1432_v57 = vpack.c.bf16 %v1421_v30, %v1421_v30  ;;  %v1145_v3 = vadd.f32 %v1125_v5, %v992_v43 }
 0x150   : > { %v974_v45 = vpop.f32.mrf.mxu1 }
 0x151   : > { %1444 = vst.msk [vmem:[%s2340_s21 + $0x14] sm:$0xf] %vm1438_vm8, %v1432_v57  ;;  %v1302_v4 = vadd.f32 %v1282_v55, %v1145_v3  ;;  %v1287_v33 = vpop.f32.mrf.mxu3  ;;  %v993_v42 = vadd.f32 %v974_v45, %v2317_v59 }
 0x153   : > { %v1407_v35 = vadd.f32 %v1387_v46, %v1302_v4  ;;  %v1394_v41 = vpop.f32.mrf.mxu0 }
 0x155   : > { %v1422_v36 = vadd.f32 %v2332_v39, %v1407_v35 }
 0x156   : > { %v1127_v22 = vpop.f32.mrf.mxu2 }
 0x157   : > { %v1433_v44 = vpack.c.bf16 %v1422_v36, %v1422_v36  ;;  %v1146_v8 = vadd.f32 %v1127_v22, %v993_v42 }
 0x158   : > { %v977_v37 = vpop.f32.mrf.mxu1 }
 0x159   : > { %1445 = vst.msk [vmem:[%s2340_s21 + $0x18] sm:$0xf] %vm1438_vm8, %v1433_v44  ;;  %v1303_v47 = vadd.f32 %v1284_v34, %v1146_v8  ;;  %v1289_v58 = vpop.f32.mrf.mxu3  ;;  %v994_v40 = vadd.f32 %v977_v37, %v2320_v1 }
 0x15b   : > { %v1408_v61 = vadd.f32 %v1389_v12, %v1303_v47  ;;  %v1397_v6 = vpop.f32.mrf.mxu0 }
 0x15d   : > { %v1423_v9 = vadd.f32 %v2332_v39, %v1408_v61 }
 0x15e   : > { %v1130_v48 = vpop.f32.mrf.mxu2 }
 0x15f   : > { %v1434_v32 = vpack.c.bf16 %v1423_v9, %v1423_v9  ;;  %v1147_v38 = vadd.f32 %v1130_v48, %v994_v40 }
 0x160   : > { %v979_v59 = vpop.f32.mrf.mxu1 }
 0x161   : > { %1446 = vst.msk [vmem:[%s2340_s21 + $0x1c] sm:$0xf] %vm1438_vm8, %v1434_v32  ;;  %v1304_v49 = vadd.f32 %v1287_v33, %v1147_v38  ;;  %v1292_v51 = vpop.f32.mrf.mxu3  ;;  %v995_v26 = vadd.f32 %v979_v59, %v2323_v15 }
 0x163   : > { %v1409_v31 = vadd.f32 %v1392_v54, %v1304_v49  ;;  %v1399_v53 = vpop.f32.mrf.mxu0 }
 0x165   : > { %v1424_v56 = vadd.f32 %v2332_v39, %v1409_v31 }
 0x166   : > { %v1132_v60 = vpop.f32.mrf.mxu2 }
 0x167   : > { %v1435_v63 = vpack.c.bf16 %v1424_v56, %v1424_v56  ;;  %v1148_v7 = vadd.f32 %v1132_v60, %v995_v26 }
 0x168   : > { %v982_v1 = vpop.f32.mrf.mxu1 }
 0x169   : > { %1447 = vst.msk [vmem:[%s2340_s21 + $0x20] sm:$0xf] %vm1438_vm8, %v1435_v63  ;;  %v1305_v62 = vadd.f32 %v1289_v58, %v1148_v7  ;;  %v1294_v18 = vpop.f32.mrf.mxu3  ;;  %v996_v46 = vadd.f32 %v982_v1, %v2326_v27 }
 0x16b   : > { %v1410_v28 = vadd.f32 %v1394_v41, %v1305_v62 }
 0x16d   : > { %v1425_v0 = vadd.f32 %v2332_v39, %v1410_v28 }
 0x16e   : > { %v1135_v2 = vpop.f32.mrf.mxu2 }
 0x16f   : > { %v1436_v13 = vpack.c.bf16 %v1425_v0, %v1425_v0  ;;  %v1149_v50 = vadd.f32 %v1135_v2, %v996_v46 }
 0x170   : > { %v984_v17 = vpop.f32.mrf.mxu1 }
 0x171   : > { %1448 = vst.msk [vmem:[%s2340_s21 + $0x24] sm:$0xf] %vm1438_vm8, %v1436_v13  ;;  %v1306_v15 = vadd.f32 %v1292_v51, %v1149_v50 }
 0x173   : > { %v1411_v52 = vadd.f32 %v1397_v6, %v1306_v15 }
 0x175   : > { %v1426_v29 = vadd.f32 %v2332_v39, %v1411_v52 }
 0x176   : > { %v1137_v14 = vpop.f32.mrf.mxu2 }
 0x177   : > { %v1437_v55 = vpack.c.bf16 %v1426_v29, %v1426_v29 }
 0x179   : > { %1449 = vst.msk [vmem:[%s2340_s21 + $0x28] sm:$0xf] %vm1438_vm8, %v1437_v55 }
 0x17a PF: > { %s13_s12 = sadd.s32 1, %s1865_s12  }
 0x17b   : > { %p10_p4 = scmp.ge.s32.totalorder %s13_s12, 4  }
 0x17d   :  { %12 = sbr.rel (!%p10_p4) target bundleno = 1 (0x1), region = 62 }

</bundles_post_ra>
